<compile_context>
chip_gen: v5e
topology: v5e:2x2
jax: 0.10.0
libtpu: 0.0.40
codegen_flags: <defaults>
</compile_context>

<pallas_src>
import jax
import jax.numpy as jnp
from jax.experimental import pallas as pl
from jax.experimental.pallas import tpu as pltpu

TILE_B_MAX = 1024   # per review: 1024-2048 amortizes per-step overhead; 1024 is
                    # comfortably inside v5e's 16 MiB scoped VMEM as well.
F_IN = 2
HIDDEN = 128
N_OUT = 4


def mlp_kernel(x_ref, w1_ref, b1_ref, w2_ref, b2_ref, w3_ref, b3_ref, o_ref):
    x = x_ref[...]  # (TILE_B, 2)

    # Layer 1: Linear(2, 128) + ReLU as two VPU broadcast FMAs (K=2 on the MXU
    # would use 2/256 rows of the array for a full push).
    h1 = (x[:, 0:1] * w1_ref[0:1, :]
          + x[:, 1:2] * w1_ref[1:2, :]
          + b1_ref[...])
    h1 = jnp.maximum(h1, 0.0)

    # Layer 2: Linear(128, 128) + ReLU (MXU, f32 accumulate).
    h2 = jnp.dot(h1, w2_ref[...], preferred_element_type=jnp.float32) + b2_ref[...]
    h2 = jnp.maximum(h2, 0.0)

    # Layer 3: Linear(128, 4) -> narrow (TILE_B, 4) store; HBM writeback is
    # 32x smaller than a lane-padded (TILE_B, 128) output, same vst count.
    out = jnp.dot(h2, w3_ref[...], preferred_element_type=jnp.float32) + b3_ref[...]
    o_ref[...] = out.astype(o_ref.dtype)


@jax.jit
def net_forward(x, params):
    """x: (B, 2) float32; params: dict of w1,b1,w2,b2,w3,b3. Returns (B, 4)."""
    B, f_in = x.shape
    assert f_in == F_IN, f_in
    w1, b1, w2, b2, w3, b3 = (params[k] for k in ("w1", "b1", "w2", "b2", "w3", "b3"))

    # Per-shape tile (static under jit): small inference batches use a small
    # tile (no padding to 1024 rows), large batches use the full TILE_B_MAX.
    tile_b = min(TILE_B_MAX, ((B + 7) // 8) * 8)
    num_tiles = pl.cdiv(B, tile_b)
    B_pad = num_tiles * tile_b
    if B_pad != B:
        x = jnp.pad(x, ((0, B_pad - B), (0, 0)))

    # Weights/biases: constant block index -> DMA'd once, stay VMEM-resident
    # across the whole batch grid. (pipeline_mode=pl.Buffered(1) could shave a
    # dead second buffer per resident input; skipped — VMEM headroom is large.)
    resident = lambda a: pl.BlockSpec(a.shape, lambda i: (0,) * a.ndim,
                                      memory_space=pltpu.VMEM)

    out = pl.pallas_call(
        mlp_kernel,
        out_shape=jax.ShapeDtypeStruct((B_pad, N_OUT), jnp.float32),
        grid=(num_tiles,),
        in_specs=[
            pl.BlockSpec((tile_b, F_IN), lambda i: (i, 0), memory_space=pltpu.VMEM),
            resident(w1), resident(b1),
            resident(w2), resident(b2),
            resident(w3), resident(b3),
        ],
        out_specs=pl.BlockSpec((tile_b, N_OUT), lambda i: (i, 0),
                               memory_space=pltpu.VMEM),
        compiler_params=pltpu.CompilerParams(
            # Batch axis is embarrassingly parallel; on v7x, CORE_PARALLEL could
            # be used here to force 2-TC sharding (kept PARALLEL for portability
            # across v5e/v6e single-TC chips).
            dimension_semantics=(pltpu.PARALLEL,)),
    )(x, w1, b1, w2, b2, w3, b3)

    return out[:B] if B_pad != B else out


def init_params(key):
    """Deterministic init matching PyTorch nn.Linear:
    U(-1/sqrt(fan_in), 1/sqrt(fan_in)) for both weight and bias."""
    ks = jax.random.split(key, 6)

    def linear(kw, kb, fan_in, fan_out):
        bound = 1.0 / jnp.sqrt(jnp.float32(fan_in))
        w = jax.random.uniform(kw, (fan_in, fan_out), jnp.float32, -bound, bound)
        b = jax.random.uniform(kb, (1, fan_out), jnp.float32, -bound, bound)
        return w, b

    w1, b1 = linear(ks[0], ks[1], F_IN, HIDDEN)
    w2, b2 = linear(ks[2], ks[3], HIDDEN, HIDDEN)
    w3, b3 = linear(ks[4], ks[5], HIDDEN, N_OUT)
    return {"w1": w1, "b1": b1, "w2": w2, "b2": b2, "w3": w3, "b3": b3}


def reference_forward(x, p):
    h1 = jnp.maximum(x @ p["w1"] + p["b1"], 0.0)
    h2 = jnp.maximum(h1 @ p["w2"] + p["b2"], 0.0)
    return h2 @ p["w3"] + p["b3"]


if __name__ == "__main__":
    key = jax.random.PRNGKey(0)
    k_param, k_x1, k_x2 = jax.random.split(key, 3)
    params = init_params(k_param)

    # Small batch of 2-dim states (typical DQN action-selection call).
    x_small = jax.random.normal(k_x1, (8, F_IN), dtype=jnp.float32)
    out_small = jax.block_until_ready(net_forward(x_small, params))
    ref_small = reference_forward(x_small, params)
    assert out_small.shape == (8, N_OUT), out_small.shape
    assert jnp.allclose(out_small, ref_small, atol=1e-5, rtol=1e-5), "mismatch (B=8)"

    # A batch that spans multiple grid tiles and is not a multiple of the tile.
    x_big = jax.random.normal(k_x2, (2 * TILE_B_MAX + 40, F_IN), dtype=jnp.float32)
    out_big = jax.block_until_ready(net_forward(x_big, params))
    ref_big = reference_forward(x_big, params)
    assert out_big.shape == (x_big.shape[0], N_OUT), out_big.shape
    assert jnp.allclose(out_big, ref_big, atol=1e-5, rtol=1e-5), "mismatch (big B)"

    print("KERNEL_OK")
</pallas_src>

<mosaic_0001>
module attributes {stable_mosaic.version = 11 : i64} {
  func.func @mlp_kernel(%arg0: i32, %arg1: memref<8x2xf32, #tpu.memory_space<vmem>>, %arg2: memref<2x128xf32, #tpu.memory_space<vmem>>, %arg3: memref<1x128xf32, #tpu.memory_space<vmem>>, %arg4: memref<128x128xf32, #tpu.memory_space<vmem>>, %arg5: memref<1x128xf32, #tpu.memory_space<vmem>>, %arg6: memref<128x4xf32, #tpu.memory_space<vmem>>, %arg7: memref<1x4xf32, #tpu.memory_space<vmem>>, %arg8: memref<8x4xf32, #tpu.memory_space<vmem>>) attributes {dimension_semantics = [#tpu.dimension_semantics<parallel>], iteration_bounds = array<i64: 1>, scalar_prefetch = 0 : i64, scratch_operands = 0 : i64, tpu.core_type = #tpu.core_type<tc>, window_params = [{transform_indices = @transform_0, window_bounds = array<i64: 8, 2>}, {pipeline_mode = #tpu.pipeline_mode<synchronous>, transform_indices = @transform_1, window_bounds = array<i64: 2, 128>}, {pipeline_mode = #tpu.pipeline_mode<synchronous>, transform_indices = @transform_2, window_bounds = array<i64: 1, 128>}, {pipeline_mode = #tpu.pipeline_mode<synchronous>, transform_indices = @transform_3, window_bounds = array<i64: 128, 128>}, {pipeline_mode = #tpu.pipeline_mode<synchronous>, transform_indices = @transform_4, window_bounds = array<i64: 1, 128>}, {pipeline_mode = #tpu.pipeline_mode<synchronous>, transform_indices = @transform_5, window_bounds = array<i64: 128, 4>}, {pipeline_mode = #tpu.pipeline_mode<synchronous>, transform_indices = @transform_6, window_bounds = array<i64: 1, 4>}, {transform_indices = @transform_7, window_bounds = array<i64: 8, 4>}]} {
    %c0 = arith.constant 0 : index
    %c0_0 = arith.constant 0 : index
    %0 = vector.load %arg1[%c0, %c0_0] : memref<8x2xf32, #tpu.memory_space<vmem>>, vector<8x2xf32>
    %1 = vector.extract_strided_slice %0 {offsets = [0, 0], sizes = [8, 1], strides = [1, 1]} : vector<8x2xf32> to vector<8x1xf32>
    %c0_1 = arith.constant 0 : index
    %c0_2 = arith.constant 0 : index
    %2 = vector.load %arg2[%c0_1, %c0_2] : memref<2x128xf32, #tpu.memory_space<vmem>>, vector<1x128xf32>
    %3 = vector.broadcast %1 : vector<8x1xf32> to vector<8x128xf32>
    %4 = vector.broadcast %2 : vector<1x128xf32> to vector<8x128xf32>
    %5 = arith.mulf %3, %4 : vector<8x128xf32>
    %6 = vector.extract_strided_slice %0 {offsets = [0, 1], sizes = [8, 1], strides = [1, 1]} : vector<8x2xf32> to vector<8x1xf32>
    %c1 = arith.constant 1 : index
    %c0_3 = arith.constant 0 : index
    %7 = vector.load %arg2[%c1, %c0_3] : memref<2x128xf32, #tpu.memory_space<vmem>>, vector<1x128xf32>
    %8 = vector.broadcast %6 : vector<8x1xf32> to vector<8x128xf32>
    %9 = vector.broadcast %7 : vector<1x128xf32> to vector<8x128xf32>
    %10 = arith.mulf %8, %9 : vector<8x128xf32>
    %11 = arith.addf %5, %10 : vector<8x128xf32>
    %c0_4 = arith.constant 0 : index
    %c0_5 = arith.constant 0 : index
    %12 = vector.load %arg3[%c0_4, %c0_5] : memref<1x128xf32, #tpu.memory_space<vmem>>, vector<1x128xf32>
    %13 = vector.broadcast %12 : vector<1x128xf32> to vector<8x128xf32>
    %14 = arith.addf %11, %13 : vector<8x128xf32>
    %cst = arith.constant 0.000000e+00 : f32
    %15 = vector.broadcast %cst : f32 to vector<8x128xf32>
    %16 = arith.maximumf %14, %15 : vector<8x128xf32>
    %c0_6 = arith.constant 0 : index
    %c0_7 = arith.constant 0 : index
    %17 = vector.load %arg4[%c0_6, %c0_7] : memref<128x128xf32, #tpu.memory_space<vmem>>, vector<128x128xf32>
    %cst_8 = arith.constant dense<0.000000e+00> : vector<8x128xf32>
    %18 = tpu.matmul %16, %17, %cst_8 {dimension_numbers = #tpu.dot_dimension_numbers<[1], [0], [0], [1], [0, 0, 1, 1], [], []>} : vector<8x128xf32>, vector<128x128xf32>, vector<8x128xf32> -> vector<8x128xf32>
    %c0_9 = arith.constant 0 : index
    %c0_10 = arith.constant 0 : index
    %19 = vector.load %arg5[%c0_9, %c0_10] : memref<1x128xf32, #tpu.memory_space<vmem>>, vector<1x128xf32>
    %20 = vector.broadcast %19 : vector<1x128xf32> to vector<8x128xf32>
    %21 = arith.addf %18, %20 : vector<8x128xf32>
    %cst_11 = arith.constant 0.000000e+00 : f32
    %22 = vector.broadcast %cst_11 : f32 to vector<8x128xf32>
    %23 = arith.maximumf %21, %22 : vector<8x128xf32>
    %c0_12 = arith.constant 0 : index
    %c0_13 = arith.constant 0 : index
    %24 = vector.load %arg6[%c0_12, %c0_13] : memref<128x4xf32, #tpu.memory_space<vmem>>, vector<128x4xf32>
    %cst_14 = arith.constant dense<0.000000e+00> : vector<8x4xf32>
    %25 = tpu.matmul %23, %24, %cst_14 {dimension_numbers = #tpu.dot_dimension_numbers<[1], [0], [0], [1], [0, 0, 1, 1], [], []>} : vector<8x128xf32>, vector<128x4xf32>, vector<8x4xf32> -> vector<8x4xf32>
    %c0_15 = arith.constant 0 : index
    %c0_16 = arith.constant 0 : index
    %26 = vector.load %arg7[%c0_15, %c0_16] : memref<1x4xf32, #tpu.memory_space<vmem>>, vector<1x4xf32>
    %27 = vector.broadcast %26 : vector<1x4xf32> to vector<8x4xf32>
    %28 = arith.addf %25, %27 : vector<8x4xf32>
    %c0_17 = arith.constant 0 : index
    %c0_18 = arith.constant 0 : index
    %29 = vector.load %arg8[%c0_17, %c0_18] : memref<8x4xf32, #tpu.memory_space<vmem>>, vector<8x4xf32>
    tpu.vector_store %arg8[%c0_17, %c0_18], %28 {strides = array<i32>} : memref<8x4xf32, #tpu.memory_space<vmem>>, vector<8x4xf32>,
    return
  }
  func.func @transform_0(%arg0: i32) -> (i32, i32) {
    %c0_i32 = arith.constant 0 : i32
    %c0_i32_0 = arith.constant 0 : i32
    return %arg0, %c0_i32 : i32, i32
  }
  func.func @transform_1(%arg0: i32) -> (i32, i32) {
    %c0_i32 = arith.constant 0 : i32
    %c0_i32_0 = arith.constant 0 : i32
    %c0_i32_1 = arith.constant 0 : i32
    return %c0_i32, %c0_i32_0 : i32, i32
  }
  func.func @transform_2(%arg0: i32) -> (i32, i32) {
    %c0_i32 = arith.constant 0 : i32
    %c0_i32_0 = arith.constant 0 : i32
    %c0_i32_1 = arith.constant 0 : i32
    return %c0_i32, %c0_i32_0 : i32, i32
  }
  func.func @transform_3(%arg0: i32) -> (i32, i32) {
    %c0_i32 = arith.constant 0 : i32
    %c0_i32_0 = arith.constant 0 : i32
    %c0_i32_1 = arith.constant 0 : i32
    return %c0_i32, %c0_i32_0 : i32, i32
  }
  func.func @transform_4(%arg0: i32) -> (i32, i32) {
    %c0_i32 = arith.constant 0 : i32
    %c0_i32_0 = arith.constant 0 : i32
    %c0_i32_1 = arith.constant 0 : i32
    return %c0_i32, %c0_i32_0 : i32, i32
  }
  func.func @transform_5(%arg0: i32) -> (i32, i32) {
    %c0_i32 = arith.constant 0 : i32
    %c0_i32_0 = arith.constant 0 : i32
    %c0_i32_1 = arith.constant 0 : i32
    return %c0_i32, %c0_i32_0 : i32, i32
  }
  func.func @transform_6(%arg0: i32) -> (i32, i32) {
    %c0_i32 = arith.constant 0 : i32
    %c0_i32_0 = arith.constant 0 : i32
    %c0_i32_1 = arith.constant 0 : i32
    return %c0_i32, %c0_i32_0 : i32, i32
  }
  func.func @transform_7(%arg0: i32) -> (i32, i32) {
    %c0_i32 = arith.constant 0 : i32
    %c0_i32_0 = arith.constant 0 : i32
    return %arg0, %c0_i32 : i32, i32
  }
}

</mosaic_0001>

<bundles_post_ra>
// kernel: net_forward.1
= control target key start
LH: loop header
LB: loop body
LE: loop exit
PB: predicated region body
PF: predicated region fallthrough
CT: control target
= control target key end

     0   :  { %v145_v0 = vmov 0   ;;  %v146_v8 = vmov 1   ;;  %vm130_vm0 = vcmask 31744   ;;  %s304_s0 = inlined_call_operand.vmem [shape: f32[8,2], index: 0, kind: input, shape index: {}]   ;;  %s305_s3 = inlined_call_operand.vmem [shape: f32[128,128], index: 3, kind: input, shape index: {}]   ;;  %s306_s1 = inlined_call_operand.vmem [shape: f32[2,128], index: 1, kind: input, shape index: {}]   ;;  %s307_s2 = inlined_call_operand.vmem [shape: f32[1,128], index: 2, kind: input, shape index: {}]   ;;  %s308_s4 = inlined_call_operand.vmem [shape: f32[1,128], index: 4, kind: input, shape index: {}]   ;;  %s309_s5 = inlined_call_operand.vmem [shape: f32[128,4], index: 5, kind: input, shape index: {}]   ;;  %s310_s6 = inlined_call_operand.vmem [shape: f32[1,4], index: 6, kind: input, shape index: {}]   ;;  %s311_s7 = inlined_call_operand.vmem [shape: f32[8,4], index: 7, kind: output, shape index: {}]  }
   0x1   :  { %138 = vset.pattern.permute.xlu0 %v145_v0  ;;  %v26_v1 = vld [vmem:[%s304_s0] sm:$0xff]  ;;  %v64_v2 = vld [vmem:[%s305_s3 + $0x78] sm:$0xff]  ;;  %v63_v3 = vld [vmem:[%s305_s3 + $0x70] sm:$0xff] }
   0x2   :  { %30 = vperm.xlu0 %138, %v26_v1   ;;  %69 = vmatpush.msra.mxu0 %v64_v2  ;;  %v62_v4 = vld [vmem:[%s305_s3 + $0x68] sm:$0xff]  ;;  %v61_v5 = vld [vmem:[%s305_s3 + $0x60] sm:$0xff]  ;;  %v60_v6 = vld [vmem:[%s305_s3 + $0x58] sm:$0xff] }
   0x3   :  { %v59_v7 = vld [vmem:[%s305_s3 + $0x50] sm:$0xff]  ;;  %v58_v9 = vld [vmem:[%s305_s3 + $0x48] sm:$0xff]  ;;  %v57_v10 = vld [vmem:[%s305_s3 + $0x40] sm:$0xff] }
   0x4   :  { %70 = vmatpush.msra.mxu0 %v63_v3  ;;  %v56_v11 = vld [vmem:[%s305_s3 + $0x38] sm:$0xff]  ;;  %v55_v12 = vld [vmem:[%s305_s3 + $0x30] sm:$0xff]  ;;  %v54_v13 = vld [vmem:[%s305_s3 + $0x28] sm:$0xff] }
   0x5   :  { %v53_v14 = vld [vmem:[%s305_s3 + $0x20] sm:$0xff]  ;;  %v52_v15 = vld [vmem:[%s305_s3 + $0x18] sm:$0xff]  ;;  %v51_v16 = vld [vmem:[%s305_s3 + $0x10] sm:$0xff] }
   0x6   :  { %71 = vmatpush.msra.mxu0 %v62_v4  ;;  %v50_v17 = vld [vmem:[%s305_s3 + $0x8] sm:$0xff]  ;;  %v49_v18 = vld [vmem:[%s305_s3] sm:$0xff]  ;;  %v105_v19 = vld [vmem:[%s309_s5 + $0x78] sm:$0xff] }
   0x7   :  { %v104_v20 = vld [vmem:[%s309_s5 + $0x70] sm:$0xff]  ;;  %110 = vmatpush.msra.mxu1 %v105_v19  ;;  %v103_v21 = vld [vmem:[%s309_s5 + $0x68] sm:$0xff]  ;;  %v102_v22 = vld [vmem:[%s309_s5 + $0x60] sm:$0xff] }
   0x8   :  { %72 = vmatpush.msra.mxu0 %v61_v5  ;;  %v101_v23 = vld [vmem:[%s309_s5 + $0x58] sm:$0xff]  ;;  %v100_v24 = vld [vmem:[%s309_s5 + $0x50] sm:$0xff]  ;;  %v99_v25 = vld [vmem:[%s309_s5 + $0x48] sm:$0xff] }
   0x9   :  { %111 = vmatpush.msra.mxu1 %v104_v20  ;;  %v98_v26 = vld [vmem:[%s309_s5 + $0x40] sm:$0xff]  ;;  %v97_v28 = vld [vmem:[%s309_s5 + $0x38] sm:$0xff]  ;;  %v96_v29 = vld [vmem:[%s309_s5 + $0x30] sm:$0xff] }
   0xa   :  { %139 = vset.pattern.permute.xlu0 %v146_v8  ;;  %73 = vmatpush.msra.mxu0 %v60_v6  ;;  %v95_v30 = vld [vmem:[%s309_s5 + $0x28] sm:$0xff]  ;;  %v140_v31 = vld [vmem:[%s306_s1] ss:$0 sm:$0xff]  ;;  %v141_v32 = vld [vmem:[%s306_s1 + $0x1] ss:$0 sm:$0xff] }
   0xb   :  { %37 = vperm.xlu0 %139, %v26_v1   ;;  %112 = vmatpush.msra.mxu1 %v103_v21  ;;  %v94_v33 = vld [vmem:[%s309_s5 + $0x20] sm:$0xff]  ;;  %v93_v34 = vld [vmem:[%s309_s5 + $0x18] sm:$0xff]  ;;  %v92_v42 = vld [vmem:[%s309_s5 + $0x10] sm:$0xff] }
   0xc   :  { %74 = vmatpush.msra.mxu0 %v59_v7  ;;  %v142_v38 = vld [vmem:[%s307_s2] ss:$0 sm:$0xff]  ;;  %v91_v43 = vld [vmem:[%s309_s5 + $0x8] sm:$0xff] }
   0xd   :  { %113 = vmatpush.msra.mxu1 %v102_v22  ;;  %v90_v44 = vld [vmem:[%s309_s5] sm:$0xff] }
   0xe   :  { %75 = vmatpush.msra.mxu0 %v58_v9  ;;  %v143_v45 = vld [vmem:[%s308_s4] ss:$0 sm:$0xff] }
   0xf   :  { %114 = vmatpush.msra.mxu1 %v101_v23  ;;  %v144_v49 = vld [vmem:[%s310_s6] ss:$0 sm:$0xff] }
  0x10   :  { %76 = vmatpush.msra.mxu0 %v57_v10 }
  0x11   :  { %115 = vmatpush.msra.mxu1 %v100_v24 }
  0x12   :  { %77 = vmatpush.msra.mxu0 %v56_v11 }
  0x13   :  { %116 = vmatpush.msra.mxu1 %v99_v25 }
  0x14   :  { %78 = vmatpush.msra.mxu0 %v55_v12 }
  0x15   :  { %117 = vmatpush.msra.mxu1 %v98_v26 }
  0x16   :  { %79 = vmatpush.msra.mxu0 %v54_v13 }
  0x17   :  { %118 = vmatpush.msra.mxu1 %v97_v28 }
  0x18   :  { %80 = vmatpush.msra.mxu0 %v53_v14 }
  0x19   :  { %119 = vmatpush.msra.mxu1 %v96_v29 }
  0x1a   :  { %81 = vmatpush.msra.mxu0 %v52_v15 }
  0x1b   :  { %120 = vmatpush.msra.mxu1 %v95_v30 }
  0x1c   :  { %82 = vmatpush.msra.mxu0 %v51_v16 }
  0x1d   :  { %121 = vmatpush.msra.mxu1 %v94_v33 }
  0x1e   :  { %83 = vmatpush.msra.mxu0 %v50_v17 }
  0x1f   :  { %122 = vmatpush.msra.mxu1 %v93_v34 }
  0x20   :  { %84 = vmatpush.msra.mxu0 %v49_v18 }
  0x21   :  { %123 = vmatpush.msra.mxu1 %v92_v42 }
  0x23   :  { %124 = vmatpush.msra.mxu1 %v91_v43 }
  0x25   :  { %125 = vmatpush.msra.mxu1 %v90_v44 }
  0x74   :  { %v31_v27 = vpop.permute.xlu0 %30 }
  0x75   :  { %v34_v36 = vmul.f32 %v140_v31, %v31_v27 }
  0x7d   :  { %v38_v35 = vpop.permute.xlu0 %37 }
  0x7e   :  { %v41_v37 = vmul.f32 %v141_v32, %v38_v35 }
  0x80   :  { %v42_v39 = vadd.f32 %v41_v37, %v34_v36 }
  0x82   :  { %v47_v40 = vadd.f32 %v142_v38, %v42_v39 }
  0x84   :  { %v48_v41 = vmax.f32 %v47_v40, 0.0 }
  0x86   :  { %85 = vmatmul.f32.vlgmr.msra.gmra.mxu0 %v48_v41 }
 0x103   :  { %v86_v46 = vpop.f32.mrf.mxu0 }
 0x104   :  { %v87_v47 = vadd.f32 %v143_v45, %v86_v46 }
 0x106   :  { %v89_v48 = vmax.f32 %v87_v47, 0.0 }
 0x108   :  { %126 = vmatmul.f32.vlgmr.msra.gmra.mxu1 %v89_v48 }
 0x185   :  { %v127_v50 = vpop.f32.mrf.mxu1 }
 0x186   :  { %v128_v51 = vadd.f32 %v144_v49, %v127_v50 }
 0x188   :  { %131 = vst.msk [vmem:[%s311_s7] sm:$0xff] %vm130_vm0, %v128_v51 }

</bundles_post_ra>
